<compile_context>
chip_gen: v6e
topology: v6e:2x2x1
jax: 0.10.0
libtpu: 0.0.40
codegen_flags: <defaults>
</compile_context>

<pallas_src>
import jax
import jax.numpy as jnp
from jax import lax
from jax.experimental import pallas as pl
from jax.experimental.pallas import tpu as pltpu

LANE = 128


def _round_up(x, m):
    return -(-x // m) * m


def _vmem_capacity_bytes():
    """Physical VMEM per TensorCore (generation aware, with a safe fallback)."""
    try:
        return int(pltpu.get_tpu_info().vmem_capacity_bytes)
    except Exception:
        return 64 * 1024 * 1024  # v7x per-TC VMEM; most conservative


def _row_shift_clamped(x, s, n_rows, row_idx, edge_first, edge_last):
    """Row n of result = x[clamp(n + s, 0, n_rows - 1), :]  (replicate pad).

    `s` / `n_rows` are static Python ints.  When the sublane extent is a
    multiple of the native 8-row tiling the shift rides the XLU via
    pltpu.roll plus one VPU select for the clamped boundary (edge broadcasts
    and the row iota are hoisted by the caller).  Otherwise (tiny N) a
    static-slice + sublane-concat construction is used; its copies are
    negligible at that size.
    """
    if s == 0 or n_rows == 1:
        return x
    if n_rows % 8 == 0:
        # jnp.roll semantics: rolled[n] = x[(n - shift) % N]; with
        # shift = (-s) % N this is x[(n + s) % N].
        rolled = pltpu.roll(x, shift=(-s) % n_rows, axis=0)
        if s > 0:
            return jnp.where(row_idx >= n_rows - s, edge_last, rolled)
        return jnp.where(row_idx < -s, edge_first, rolled)
    cols = x.shape[1]
    if s > 0:
        s = min(s, n_rows - 1)
        body = x[s:, :]
        edge = jnp.broadcast_to(x[n_rows - 1:n_rows, :], (s, cols))
        return jnp.concatenate([body, edge], axis=0)
    s = min(-s, n_rows - 1)
    body = x[: n_rows - s, :]
    edge = jnp.broadcast_to(x[0:1, :], (s, cols))
    return jnp.concatenate([edge, body], axis=0)


def mean_filter(x, filter_size):
    assert filter_size % 2 == 1, (
        "MeanFilter only round-trips shapes for odd filter_size "
        "(even sizes give an N+1-length conv output in the PyTorch reference)."
    )
    N, C, H, W = x.shape
    D = C * H * W
    in_dtype = x.dtype
    itemsize = jnp.dtype(in_dtype).itemsize
    p = filter_size // 2
    inv_fs = 1.0 / float(filter_size)

    x2 = x.reshape(N, D)  # free reshape, keeps original dtype

    # ---- Generation-aware tile sizing (memory-bound: as wide as VMEM allows) ----
    vmem_cap = _vmem_capacity_bytes()
    tile_budget = vmem_cap // 2          # 32 MiB on v7x, 64 MiB on v5e/v6e
    vmem_limit = (vmem_cap * 3) // 4     # 48 MiB on v7x, 96 MiB on v5e/v6e
    # VMEM bytes per feature column: double-buffered in+out tiles, two
    # replicate-edge broadcasts + ~2 transient roll/where temporaries (input
    # dtype), and the fp32 accumulator + int32 row iota.
    per_col_bytes = N * (8 * itemsize + 8)
    td_max = (tile_budget // per_col_bytes) // LANE * LANE
    td_max = max(LANE, min(td_max, 8192))  # diminishing returns past ~8k lanes

    Dp = _round_up(D, LANE)
    TD = min(td_max, Dp)
    # Prefer >= 2 grid steps over D (pipelining + v7x two-TC sharding) while
    # tiles stay >= 512 lanes; never shrink further (width >> step count on
    # single-TC v5e/v6e).
    while TD >= 1024 and TD % 256 == 0 and pl.cdiv(D, TD) < 2:
        TD //= 2
    if TD >= Dp and Dp != D:
        # Single block covering all of D: make its width exactly D (a block dim
        # equal to the full array dim is always legal) -> no padded lanes.
        TD = D
    grid = (pl.cdiv(D, TD),)
    # No wrapper-side jnp.pad / slicing: if D % TD != 0 the last block is a
    # ragged partial block; OOB lane reads are harmless (filter acts only along
    # N) and OOB stores are masked by Pallas.
    # TODO(synk): for very large N (td_max collapsing below ~512 lanes) add a
    # second grid axis over N with +/-p halo rows so both axes tile wide.

    use_roll = (N % 8 == 0) and (N > 1)

    def kernel(x_ref, o_ref):
        xin = x_ref[...]                       # (N, TD) in input dtype
        acc = xin.astype(jnp.float32)          # tap s = 0, fp32 accumulate
        if p > 0:
            if use_roll:
                # Hoisted once per tile (JAX does not CSE broadcast_in_dim).
                row_idx = lax.broadcasted_iota(jnp.int32, xin.shape, 0)
                edge_first = jnp.broadcast_to(xin[:1, :], xin.shape)
                edge_last = jnp.broadcast_to(xin[N - 1:, :], xin.shape)
            else:
                row_idx = edge_first = edge_last = None
            for s in range(1, p + 1):          # static unroll (small filter_size)
                up = _row_shift_clamped(xin, s, N, row_idx, edge_first, edge_last)
                dn = _row_shift_clamped(xin, -s, N, row_idx, edge_first, edge_last)
                # Cast during accumulation (no up-front fp32 copy of each tap).
                acc = acc + up.astype(jnp.float32) + dn.astype(jnp.float32)
        o_ref[...] = (acc * inv_fs).astype(o_ref.dtype)

    out = pl.pallas_call(
        kernel,
        out_shape=jax.ShapeDtypeStruct((N, D), in_dtype),
        grid_spec=pltpu.PrefetchScalarGridSpec(
            num_scalar_prefetch=0,
            grid=grid,
            in_specs=[pl.BlockSpec((N, TD), lambda j: (0, j))],
            out_specs=pl.BlockSpec((N, TD), lambda j: (0, j)),
        ),
        compiler_params=pltpu.CompilerParams(
            dimension_semantics=("parallel",),
            vmem_limit_bytes=int(vmem_limit),
        ),
        cost_estimate=pl.CostEstimate(
            flops=int(N) * int(D) * (filter_size + 1),
            transcendentals=0,
            bytes_accessed=2 * int(N) * int(D) * int(itemsize),
        ),
    )(x2)

    return out.reshape(N, C, H, W)


def _reference(x, filter_size):
    """Pure-JAX reference matching the PyTorch semantics."""
    N, C, H, W = x.shape
    D = C * H * W
    p = filter_size // 2
    s = x.reshape(N, D).astype(jnp.float32)
    idx = jnp.clip(
        jnp.arange(N)[:, None] + jnp.arange(filter_size)[None, :] - p, 0, N - 1
    )  # (N, fs)
    return jnp.mean(s[idx], axis=1).reshape(N, C, H, W).astype(x.dtype)


if __name__ == "__main__":
    key = jax.random.PRNGKey(0)
    cases = [
        ((2, 4, 16, 16), 3, jnp.float32),   # D=1024 -> TD=512, grid=2 (multi-tile)
        ((8, 2, 8, 8), 5, jnp.float32),     # N=8 -> pltpu.roll shift path
        ((5, 3, 7, 11), 7, jnp.float32),    # D=231 (non-128-multiple), heavy clamp
        ((2, 2, 8, 8), 7, jnp.bfloat16),    # filter wider than 2N-1, bf16 path
    ]
    for i, (shape, fs, dt) in enumerate(cases):
        key, sub = jax.random.split(key)
        x = jax.random.normal(sub, shape, dtype=jnp.float32).astype(dt)
        y = jax.block_until_ready(mean_filter(x, fs))
        y_ref = _reference(x, fs)
        assert y.shape == x.shape and y.dtype == x.dtype, f"shape/dtype mismatch in case {i}"
        tol = 1e-5 if dt == jnp.float32 else 2e-2
        assert jnp.allclose(
            y.astype(jnp.float32), y_ref.astype(jnp.float32), atol=tol, rtol=tol
        ), f"mismatch vs reference in case {i}"
    print("KERNEL_OK")
</pallas_src>

<mosaic_0001>
module attributes {stable_mosaic.version = 11 : i64} {
  func.func @kernel(%arg0: i32, %arg1: memref<2x512xf32, #tpu.memory_space<vmem>>, %arg2: memref<2x512xf32, #tpu.memory_space<vmem>>) attributes {dimension_semantics = [#tpu.dimension_semantics<parallel>], iteration_bounds = array<i64: 2>, scalar_prefetch = 0 : i64, scratch_operands = 0 : i64, tpu.core_type = #tpu.core_type<tc>, window_params = [{transform_indices = @transform_0, window_bounds = array<i64: 2, 512>}, {transform_indices = @transform_1, window_bounds = array<i64: 2, 512>}]} {
    %c0 = arith.constant 0 : index
    %c0_0 = arith.constant 0 : index
    %0 = vector.load %arg1[%c0, %c0_0] : memref<2x512xf32, #tpu.memory_space<vmem>>, vector<2x512xf32>
    %1 = vector.extract_strided_slice %0 {offsets = [1, 0], sizes = [1, 512], strides = [1, 1]} : vector<2x512xf32> to vector<1x512xf32>
    %2 = vector.extract_strided_slice %0 {offsets = [1, 0], sizes = [1, 512], strides = [1, 1]} : vector<2x512xf32> to vector<1x512xf32>
    %3 = tpu.concatenate %1, %2 in 0 : vector<1x512xf32>, vector<1x512xf32> -> vector<2x512xf32>
    %4 = vector.extract_strided_slice %0 {offsets = [0, 0], sizes = [1, 512], strides = [1, 1]} : vector<2x512xf32> to vector<1x512xf32>
    %5 = vector.extract_strided_slice %0 {offsets = [0, 0], sizes = [1, 512], strides = [1, 1]} : vector<2x512xf32> to vector<1x512xf32>
    %6 = tpu.concatenate %5, %4 in 0 : vector<1x512xf32>, vector<1x512xf32> -> vector<2x512xf32>
    %7 = arith.addf %0, %3 : vector<2x512xf32>
    %8 = arith.addf %7, %6 : vector<2x512xf32>
    %cst = arith.constant 0.333333343 : f32
    %9 = vector.broadcast %cst : f32 to vector<2x512xf32>
    %10 = arith.mulf %8, %9 : vector<2x512xf32>
    %c0_1 = arith.constant 0 : index
    %c0_2 = arith.constant 0 : index
    %11 = vector.load %arg2[%c0_1, %c0_2] : memref<2x512xf32, #tpu.memory_space<vmem>>, vector<2x512xf32>
    tpu.vector_store %arg2[%c0_1, %c0_2], %10 {strides = array<i32>} : memref<2x512xf32, #tpu.memory_space<vmem>>, vector<2x512xf32>,
    return
  }
  func.func @transform_0(%arg0: i32) -> (i32, i32) {
    %c0_i32 = arith.constant 0 : i32
    %c0_i32_0 = arith.constant 0 : i32
    return %c0_i32, %arg0 : i32, i32
  }
  func.func @transform_1(%arg0: i32) -> (i32, i32) {
    %c0_i32 = arith.constant 0 : i32
    %c0_i32_0 = arith.constant 0 : i32
    return %c0_i32, %arg0 : i32, i32
  }
}

</mosaic_0001>

<bundles_post_ra>
// kernel: tpu_custom_call.1
= control target key start
LH: loop header
LB: loop body
LE: loop exit
PB: predicated region body
PF: predicated region fallthrough
CT: control target
= control target key end

     0   :  { %6 = vsyncpa [#allocation3], 0  ;;  %s625_s0 = inlined_call_operand.hbm [shape: f32[2,1024], index: 0, kind: input, shape index: {}]   ;;  %s626_s1 = inlined_call_operand.hbm [shape: f32[2,1024], index: 1, kind: output, shape index: {}]  }
   0x1   :  { %8 = vsyncpa [#allocation3 + $0x1], 0 }
   0x2   :  { %9 = vsyncpa [#allocation4], 0 }
   0x3   :  { %11 = vsyncpa [#allocation4 + $0x1], 0  ;;  %s480_s6 = smov 0   ;;  %s482_s7 = smov 0  }
   0x4   :  { %s484_s8 = smov 0   ;;  %s486_s9 = smov 0  }
   0x5 LB: > { %s501_s10 = sadd.s32 4294967295, %s465_s9   ;;  %s310_s11 = sadd.s32 4294967294, %s465_s9   ;;  %s465_s9 = sphi %s486_s9, %s643_s9   ;;  %s461_s8 = sphi %s484_s8, %s642_s8   ;;  %s457_s7 = sphi %s482_s7, %s641_s7   ;;  %s453_s6 = sphi %s480_s6, %s640_s6  }
   0x6   : > { %s505_s12 = sadd.s32 1, %s465_s9   ;;  %s24_s13 = sadd.s32 1, %s461_s8 }
   0x7   : > { %s21_s14 = ssub.s32 %s465_s9, %s505_s12  ;;  %p31_p0 = scmp.ne.s32.totalorder %s461_s8, %s457_s7 }
   0x8   : > { %p22_p1 = scmp.eq.s32.totalorder %s21_s14, 0  ;;  %p32_p2 = scmp.eq.s32.totalorder %s465_s9, 0 }
   0x9   : > { %p37_p3 = scmp.ne.s32.totalorder %s457_s7, %s453_s6  ;;  %p38_p4 = scmp.eq.s32.totalorder %s501_s10, 0 }
   0xa   : > { %s517_s15 = scalar_select %p22_p1, %s461_s8, %s24_s13  }
   0xb   : > { %p519_p5 = por %p32_p2, %p31_p0  ;;  %p523_p6 = por %p38_p4, %p37_p3 }
   0xc   : > { %p61_p7 = scmp.eq.s32.totalorder %s501_s10, 1  ;;  %p67_p8 = scmp.eq.s32.totalorder %s310_s11, 1 }
   0xd   : > { %s630_s17 = scalar_select %p523_p6, 1, 0 }
   0xe   : > { %p338_p10 = scmp.lt.s32.totalorder %s465_s9, 2  ;;  %p530_p11 = por %p61_p7, %p31_p0 }
   0xf   : > { %p534_p12 = por %p67_p8, %p37_p3  ;;  %s87_s20 = sand.u32 1, %s461_s8  }
  0x10   : > { %s631_s18 = scalar_select %p530_p11, 1, 0 }
  0x11   : > { %s632_s19 = scalar_select %p534_p12, 1, 0 }
  0x12   : > { %s324_s21 = sshll.u32 %s465_s9, 7  ;;  %s313_s22 = sshll.u32 %s87_s20, 3 }
  0x13   : > { %s543_s25 = scalar_lea.hbm %s625_s0, %s324_s21  ;;  %s91_s26 = scalar_lea.vmem [#allocation2], %s313_s22 }
  0x14   : > { %s99_s27 = sshll.u32 %s91_s26, 4  ;;  %p547_p13 = pnand %p338_p10, %p519_p5  ;;  %s551_s27 = int_to_ptr.vmem [resolvable:$true] %s99_s27 }
  0x15   : > { %s88_s29 = scalar_lea.sflag [#allocation3], %s87_s20  ;;  %s373_s30 = scalar_lea.hbm %s543_s25, 128 }
  0x16   : > { %p374_p2 = scmp.ne.s32.totalorder %s543_s25, %s373_s30  ;;  %p375_p3 = pneg %p547_p13 }
  0x17   : > { %s378_s4 = scalar_lea.hbm %s625_s0, 256  ;;  %p379_p5 = scmp.lt.s32.totalorder %s543_s25, %s625_s0 }
  0x18   : > { %p376_p4 = pnand %p375_p3, %p374_p2  ;;  %p380_p8 = scmp.lt.s32.totalorder %s378_s4, %s373_s30 }
  0x1a   : > { %p377_p7 = pneg %p376_p4  ;;  %p381_p10 = por %p380_p8, %p379_p5 }
  0x1c   : > { %p382_p9 = pnand %p381_p10, %p377_p7 }
  0x1e   : > { %385 = shalt.err (!%p382_p9)
}
  0x1f   : > { %s386_s13 = scalar_lea.vmem %s551_s27, 128  ;;  %s467_s14 = smov [#allocation2]  }
  0x20   : > { %p387_p0 = scmp.ne.s32.totalorder %s551_s27, %s386_s13  ;;  %s391_s16 = sshll.u32 %s467_s14, 4  ;;  %s392_s16 = int_to_ptr.vmem [resolvable:$false] %s391_s16 }
  0x21   : > { %s393_s20 = scalar_lea.vmem %s392_s16, 256  ;;  %p394_p4 = scmp.lt.s32.totalorder %s551_s27, %s392_s16 }
  0x22   : > { %p389_p1 = pnand %p387_p0, %p375_p3  ;;  %p395_p12 = scmp.lt.s32.totalorder %s393_s20, %s386_s13 }
  0x24   : > { %p390_p2 = pneg %p389_p1  ;;  %p396_p11 = por %p395_p12, %p394_p4 }
  0x26   : > { %p397_p6 = pnand %p396_p11, %p390_p2 }
  0x28   : > { %400 = shalt.err (!%p397_p6)
}
  0x29   : > { %333 = dma.hbm_to_vmem [thread:$0]  (!%p547_p13), %s543_s25, 128, %s551_s27, %s88_s29  }
  0x2a   : > { %p634_p9 = scmp.lt.s32.totalorder %s465_s9, 3  ;;  %p635_p7 = scmp.ge.s32.totalorder %s465_s9, 1 }
  0x2c   : > { %p105_p0 = pnand %p635_p7, %p634_p9 }
  0x2d   : > { %s578_s21 = sand.u32 (!%p105_p0), 1, %s457_s7   ;;  %p636_p6 = scmp.ne.s32.totalorder (!%p105_p0), %s630_s17, 0 }
  0x2e   : > { %108 = sbr.rel (%p105_p0) target bundleno = 86 (0x56), region = 24  ;;  %s317_s22 = sshll.u32 (!%p105_p0), %s578_s21, 3 }
  0x2f   : > { %s111_s23 = scalar_lea.sflag (!%p105_p0), [#allocation3], %s578_s21  ;;  %s114_s24 = scalar_lea.vmem (!%p105_p0), [#allocation2], %s317_s22 }
  0x33   : > { %444 = dma.done.wait (%p636_p6), %s111_s23, 128  }
  0x34   : > { %446 = vsyncadd (%p636_p6), %s111_s23, 4294967168  ;;  %v137_v0 = vlaneseq  ;;  %v468_v1 = vmov 1983009808   ;;  %v135_v13 = vld [vmem:[%s114_s24] sm:$0xff]  ;;  %s132_s17 = scalar_lea.vmem [#allocation5], %s317_s22  ;;  %s325_s26 = sshll.u32 %s501_s10, 7 }
  0x35   : > { %v184_v2 = vunpack.c.l.s4 %v468_v1  ;;  %s240_s25 = sshll.u32 %s132_s17, 4  ;;  %s238_s29 = scalar_lea.hbm %s626_s1, %s325_s26  ;;  %s241_s25 = int_to_ptr.vmem [resolvable:$true] %s240_s25 }
  0x36   : > { %v138_v3 = vshrl.u32 %v137_v0, 7  ;;  %s226_s30 = scalar_lea.sflag [#allocation4], %s578_s21  ;;  %s401_s2 = scalar_lea.vmem %s241_s25, 128 }
  0x37   : > { %v185_v4 = vunpack.c.0.s8 %v184_v2  ;;  %p402_p11 = scmp.ne.s32.totalorder %s241_s25, %s401_s2  ;;  %p637_p12 = scmp.ne.s32.totalorder %s631_s18, 0 }
  0x38   : > { %v139_v5 = vsub.s32 1, %v138_v3  ;;  %v143_v6 = vsub.s32 3, %v138_v3  ;;  %v147_v7 = vsub.s32 5, %v138_v3  ;;  %v151_v8 = vsub.s32 7, %v138_v3  ;;  %s469_s3 = smov [#allocation5]  }
  0x39   : > { %v159_v9 = vsub.s32 0, %v138_v3  ;;  %v163_v10 = vsub.s32 2, %v138_v3  ;;  %v167_v11 = vsub.s32 4, %v138_v3  ;;  %v171_v12 = vsub.s32 6, %v138_v3  ;;  %p403_p13 = pnand %p402_p11, %p637_p12  ;;  %s405_s4 = sshll.u32 %s469_s3, 4  ;;  %s406_s4 = int_to_ptr.vmem [resolvable:$false] %s405_s4 }
  0x3a   : > { %v188_v14 = vsub.s32 %v185_v4, %v138_v3  ;;  %v140_v15 = vrot.slane %v135_v13, %v139_v5  ;;  %v144_v16 = vrot.slane %v135_v13, %v143_v6  ;;  %v148_v17 = vrot.slane %v135_v13, %v147_v7  ;;  %s407_s5 = scalar_lea.vmem %s406_s4, 256  ;;  %p408_p3 = scmp.lt.s32.totalorder %s241_s25, %s406_s4 }
  0x3b   : > { %v152_v18 = vrot.slane %v135_v13, %v151_v8  ;;  %v160_v19 = vrot.slane %v135_v13, %v159_v9  ;;  %v164_v20 = vrot.slane %v135_v13, %v163_v10  ;;  %v168_v21 = vrot.slane %v135_v13, %v167_v11  ;;  %p404_p1 = pneg %p403_p13  ;;  %p409_p5 = scmp.lt.s32.totalorder %s407_s5, %s401_s2 }
  0x3c   : > { %v172_v22 = vrot.slane %v135_v13, %v171_v12  ;;  %v181_v23 = vcombine.low %v140_v15, %v144_v16 }
  0x3d   : > { %v182_v24 = vcombine.low %v148_v17, %v152_v18  ;;  %v204_v25 = vcombine.low %v160_v19, %v164_v20  ;;  %p410_p8 = por %p409_p5, %p408_p3 }
  0x3e   : > { %v205_v26 = vcombine.low %v168_v21, %v172_v22  ;;  %v189_v27 = vrot.slane %v181_v23, %v188_v14 }
  0x3f   : > { %v196_v28 = vrot.slane %v182_v24, %v188_v14  ;;  %v212_v29 = vrot.slane %v204_v25, %v188_v14  ;;  %p411_p10 = pnand %p410_p8, %p404_p1 }
  0x40   : > { %v219_v30 = vrot.slane %v205_v26, %v188_v14 }
  0x41   : > { %v197_v31 = vcombine.low %v189_v27, %v196_v28 }
  0x42   : > { %v220_v32 = vcombine.low %v212_v29, %v219_v30 }
  0x43   : > { %v199_v33 = vadd.f32 %v197_v31, %v135_v13 }
  0x45   : > { %v222_v34 = vadd.f32 %v220_v32, %v199_v33 }
  0x47   : > { %v223_v35 = vmul.f32 0.33333334, %v222_v34 }
  0x49   : > { %224 = vst [vmem:[%s132_s17] sm:$0xff] %v223_v35 }
  0x4a   : > { %414 = shalt.err (!%p411_p10)
}
  0x4b   : > { %s415_s10 = scalar_lea.hbm %s238_s29, 128  ;;  %s419_s14 = scalar_lea.hbm %s626_s1, 256 }
  0x4c   : > { %p416_p2 = scmp.ne.s32.totalorder %s238_s29, %s415_s10  ;;  %p420_p7 = scmp.lt.s32.totalorder %s238_s29, %s626_s1 }
  0x4d   : > { %p421_p0 = scmp.lt.s32.totalorder %s419_s14, %s415_s10 }
  0x4e   : > { %p417_p4 = pnand %p416_p2, %p637_p12 }
  0x4f   : > { %p422_p6 = por %p421_p0, %p420_p7 }
  0x50   : > { %p418_p9 = pneg %p417_p4 }
  0x52   : > { %p423_p11 = pnand %p422_p6, %p418_p9 }
  0x54   : > { %426 = shalt.err (!%p423_p11)
}
  0x55   : > { %328 = dma.vmem_to_hbm [thread:$0]  (%p637_p12), %s241_s25, 128, %s238_s29, %s226_s30  }
  0x56 PF: > { %s252_s21 = sand.u32 1, %s453_s6   ;;  %p638_p13 = scmp.ne.s32.totalorder %s632_s19, 0 }
  0x57   : > { %p639_p1 = scmp.ge.s32.totalorder %s465_s9, 2  ;;  %s253_s22 = scalar_lea.sflag [#allocation4], %s252_s21 }
  0x59   : > { %p335_p3 = pnand %p639_p1, %p638_p13 }
  0x5b   : > { %p336_p5 = pneg %p335_p3 }
  0x5d   : > { %448 = dma.done.wait (%p336_p5), %s253_s22, 128  }
  0x5e   : > { %450 = vsyncadd (%p336_p5), %s253_s22, 4294967168  ;;  %p14_p8 = scmp.ge.s32.totalorder %s505_s12, 4   ;;  %s640_s6 = smov %s457_s7 }
  0x5f   : > { %s641_s7 = smov %s461_s8  ;;  %s642_s8 = smov %s517_s15 }
  0x60   : > { %s643_s9 = smov %s505_s12  ;;  %16 = sbr.rel (!%p14_p8) target bundleno = 5 (0x5), region = 69 }
  0x65   :  { %258 = vsyncpa [#allocation3], 1 }
  0x66   :  { %260 = vsyncpa [#allocation3 + $0x1], 1 }
  0x67   :  { %261 = vsyncpa [#allocation4], 1 }
  0x68   :  { %263 = vsyncpa [#allocation4 + $0x1], 1 }

</bundles_post_ra>
